<compile_context>
chip_gen: v5e
topology: v5e:2x2
jax: 0.10.0
libtpu: 0.0.40
codegen_flags: <defaults>
</compile_context>

<pallas_src>
import functools

import jax
import jax.numpy as jnp
from jax.experimental import pallas as pl
from jax.experimental.pallas import tpu as pltpu

NEG_SLOPE = 0.01  # F.leaky_relu default negative_slope
LANE = 128
SUBLANE = 8


def _leaky_relu(x):
    return jnp.where(x > 0, x, NEG_SLOPE * x)


def _round_up(n, m):
    return ((n + m - 1) // m) * m


def mlp_kernel(x_ref, w1_ref, b1_ref, w2_ref, b2_ref, w3_ref, b3_ref, o_ref):
    # Matmul-input dtype follows the stored weight dtype (f32 or bf16);
    # accumulation is always f32 (preferred_element_type); bias/activation stay in f32.
    cdt = w1_ref.dtype

    x = x_ref[...].astype(cdt)

    h = jnp.dot(x, w1_ref[...], preferred_element_type=jnp.float32)
    h = _leaky_relu(h + b1_ref[...])

    h = jnp.dot(h.astype(cdt), w2_ref[...], preferred_element_type=jnp.float32)
    h = _leaky_relu(h + b2_ref[...])

    out = jnp.dot(h.astype(cdt), w3_ref[...], preferred_element_type=jnp.float32)
    out = out + b3_ref[...]

    o_ref[...] = out.astype(o_ref.dtype)


def init_params(key, state_space_n, action_space_n, hidden=50):
    """Deterministic init mimicking nn.Linear's uniform(-1/sqrt(fan_in), 1/sqrt(fan_in)).

    Weights are stored as (in_features, out_features) so the kernel computes y = x @ W + b.
    """
    ks = jax.random.split(key, 6)

    def linear(kw, kb, fan_in, fan_out):
        bound = 1.0 / jnp.sqrt(fan_in)
        w = jax.random.uniform(kw, (fan_in, fan_out), jnp.float32, -bound, bound)
        b = jax.random.uniform(kb, (1, fan_out), jnp.float32, -bound, bound)
        return w, b

    w1, b1 = linear(ks[0], ks[1], state_space_n, hidden)
    w2, b2 = linear(ks[2], ks[3], hidden, hidden)
    w3, b3 = linear(ks[4], ks[5], hidden, action_space_n)
    return (w1, b1, w2, b2, w3, b3)


def pad_params(params, matmul_dtype=jnp.float32):
    """Zero-pad hidden and output feature dims to lane-dense multiples of 128.

    Weights are optionally stored in bf16 (MXU-native inputs); biases stay f32 so the
    bias add / LeakyReLU are computed in f32.  Zero padding is exact: padded hidden
    units produce exactly 0 and padded weight rows contribute nothing downstream.
    """
    w1, b1, w2, b2, w3, b3 = params
    hidden = w1.shape[1]
    act = w3.shape[1]
    hp = _round_up(hidden, LANE)
    ap = _round_up(act, LANE)

    w1p = jnp.pad(w1, ((0, 0), (0, hp - hidden))).astype(matmul_dtype)
    b1p = jnp.pad(b1, ((0, 0), (0, hp - hidden))).astype(jnp.float32)
    w2p = jnp.pad(w2, ((0, hp - hidden), (0, hp - hidden))).astype(matmul_dtype)
    b2p = jnp.pad(b2, ((0, 0), (0, hp - hidden))).astype(jnp.float32)
    w3p = jnp.pad(w3, ((0, hp - hidden), (0, ap - act))).astype(matmul_dtype)
    b3p = jnp.pad(b3, ((0, 0), (0, ap - act))).astype(jnp.float32)
    return (w1p, b1p, w2p, b2p, w3p, b3p)


@functools.partial(jax.jit, static_argnames=("action_space_n", "block_b"))
def mlp_forward(x, padded_params, *, action_space_n, block_b=512):
    """Forward pass.  x: (B, state_space_n) f32.  Returns (B, action_space_n) f32."""
    w1, b1, w2, b2, w3, b3 = padded_params
    B, f_in = x.shape
    hp = w1.shape[1]
    ap = w3.shape[1]

    # Batch tile: multiple of 8 (sublane), capped so double-buffered x/out tiles plus the
    # resident weights stay far under the 32 MiB scoped-VMEM default on all chips.
    tb = min(block_b, _round_up(B, SUBLANE))
    b_pad = _round_up(B, tb)
    if b_pad != B:
        x = jnp.pad(x, ((0, b_pad - B), (0, 0)))

    grid = (b_pad // tb,)

    out = pl.pallas_call(
        mlp_kernel,
        out_shape=jax.ShapeDtypeStruct((b_pad, ap), jnp.float32),
        grid=grid,
        in_specs=[
            pl.BlockSpec((tb, f_in), lambda i: (i, 0)),   # x: streamed over batch
            pl.BlockSpec((f_in, hp), lambda i: (0, 0)),   # w1: resident
            pl.BlockSpec((1, hp),    lambda i: (0, 0)),   # b1: resident
            pl.BlockSpec((hp, hp),   lambda i: (0, 0)),   # w2: resident
            pl.BlockSpec((1, hp),    lambda i: (0, 0)),   # b2: resident
            pl.BlockSpec((hp, ap),   lambda i: (0, 0)),   # w3: resident
            pl.BlockSpec((1, ap),    lambda i: (0, 0)),   # b3: resident
        ],
        out_specs=pl.BlockSpec((tb, ap), lambda i: (i, 0)),
        compiler_params=pltpu.CompilerParams(
            dimension_semantics=("parallel",),  # v7x shards the batch grid across both TCs
        ),
    )(x, w1, b1, w2, b2, w3, b3)

    # Slice padding off outside the kernel (cheap XLA slice).
    return out[:B, :action_space_n]


def reference_forward(x, params):
    w1, b1, w2, b2, w3, b3 = params
    h = jax.nn.leaky_relu(x @ w1 + b1, NEG_SLOPE)
    h = jax.nn.leaky_relu(h @ w2 + b2, NEG_SLOPE)
    return h @ w3 + b3


if __name__ == "__main__":
    state_space_n = 16
    action_space_n = 4
    batch = 8

    key = jax.random.PRNGKey(0)
    k_x, k_p, k_xl = jax.random.split(key, 3)

    x = jax.random.normal(k_x, (batch, state_space_n), jnp.float32)
    params = init_params(k_p, state_space_n, action_space_n)
    ref = reference_forward(x, params)

    # --- exact f32 path (matches PyTorch module semantics) -----------------
    params_f32 = pad_params(params, matmul_dtype=jnp.float32)
    out = mlp_forward(x, params_f32, action_space_n=action_space_n)
    out = jax.block_until_ready(out)
    assert out.shape == (batch, action_space_n)
    assert jnp.allclose(out, ref, atol=1e-5, rtol=1e-5), "f32 mismatch vs reference"

    # --- bf16 matmul inputs, f32 accumulate (MXU-native fast path) ----------
    params_bf16 = pad_params(params, matmul_dtype=jnp.bfloat16)
    out_bf16 = mlp_forward(x, params_bf16, action_space_n=action_space_n)
    out_bf16 = jax.block_until_ready(out_bf16)
    assert out_bf16.shape == (batch, action_space_n)
    assert jnp.allclose(out_bf16, ref, atol=1e-1, rtol=1e-1), "bf16 mismatch vs reference"

    # --- larger batch exercising the batch grid (multiple grid steps) -------
    big_b = 1024
    x_big = jax.random.normal(k_xl, (big_b, state_space_n), jnp.float32)
    out_big = mlp_forward(x_big, params_f32, action_space_n=action_space_n, block_b=256)
    out_big = jax.block_until_ready(out_big)
    ref_big = reference_forward(x_big, params)
    assert out_big.shape == (big_b, action_space_n)
    assert jnp.allclose(out_big, ref_big, atol=1e-4, rtol=1e-4), "big-batch mismatch vs reference"

    print("KERNEL_OK")
</pallas_src>

<mosaic_0001>
module attributes {stable_mosaic.version = 11 : i64} {
  func.func @mlp_kernel(%arg0: i32, %arg1: memref<8x16xf32, #tpu.memory_space<vmem>>, %arg2: memref<16x128xf32, #tpu.memory_space<vmem>>, %arg3: memref<1x128xf32, #tpu.memory_space<vmem>>, %arg4: memref<128x128xf32, #tpu.memory_space<vmem>>, %arg5: memref<1x128xf32, #tpu.memory_space<vmem>>, %arg6: memref<128x128xf32, #tpu.memory_space<vmem>>, %arg7: memref<1x128xf32, #tpu.memory_space<vmem>>, %arg8: memref<8x128xf32, #tpu.memory_space<vmem>>) attributes {dimension_semantics = [#tpu.dimension_semantics<parallel>], iteration_bounds = array<i64: 1>, scalar_prefetch = 0 : i64, scratch_operands = 0 : i64, tpu.core_type = #tpu.core_type<tc>, window_params = [{transform_indices = @transform_0, window_bounds = array<i64: 8, 16>}, {pipeline_mode = #tpu.pipeline_mode<synchronous>, transform_indices = @transform_1, window_bounds = array<i64: 16, 128>}, {pipeline_mode = #tpu.pipeline_mode<synchronous>, transform_indices = @transform_2, window_bounds = array<i64: 1, 128>}, {pipeline_mode = #tpu.pipeline_mode<synchronous>, transform_indices = @transform_3, window_bounds = array<i64: 128, 128>}, {pipeline_mode = #tpu.pipeline_mode<synchronous>, transform_indices = @transform_4, window_bounds = array<i64: 1, 128>}, {pipeline_mode = #tpu.pipeline_mode<synchronous>, transform_indices = @transform_5, window_bounds = array<i64: 128, 128>}, {pipeline_mode = #tpu.pipeline_mode<synchronous>, transform_indices = @transform_6, window_bounds = array<i64: 1, 128>}, {transform_indices = @transform_7, window_bounds = array<i64: 8, 128>}]} {
    %c0 = arith.constant 0 : index
    %c0_0 = arith.constant 0 : index
    %0 = vector.load %arg1[%c0, %c0_0] : memref<8x16xf32, #tpu.memory_space<vmem>>, vector<8x16xf32>
    %c0_1 = arith.constant 0 : index
    %c0_2 = arith.constant 0 : index
    %1 = vector.load %arg2[%c0_1, %c0_2] : memref<16x128xf32, #tpu.memory_space<vmem>>, vector<16x128xf32>
    %cst = arith.constant dense<0.000000e+00> : vector<8x128xf32>
    %2 = tpu.matmul %0, %1, %cst {dimension_numbers = #tpu.dot_dimension_numbers<[1], [0], [0], [1], [0, 0, 1, 1], [], []>} : vector<8x16xf32>, vector<16x128xf32>, vector<8x128xf32> -> vector<8x128xf32>
    %c0_3 = arith.constant 0 : index
    %c0_4 = arith.constant 0 : index
    %3 = vector.load %arg3[%c0_3, %c0_4] : memref<1x128xf32, #tpu.memory_space<vmem>>, vector<1x128xf32>
    %4 = vector.broadcast %3 : vector<1x128xf32> to vector<8x128xf32>
    %5 = arith.addf %2, %4 : vector<8x128xf32>
    %cst_5 = arith.constant 0.000000e+00 : f32
    %6 = vector.broadcast %cst_5 : f32 to vector<8x128xf32>
    %7 = arith.cmpf ogt, %5, %6 : vector<8x128xf32>
    %cst_6 = arith.constant 0.00999999977 : f32
    %8 = vector.broadcast %cst_6 : f32 to vector<8x128xf32>
    %9 = arith.mulf %8, %5 : vector<8x128xf32>
    %10 = arith.select %7, %5, %9 : vector<8x128xi1>, vector<8x128xf32>
    %c0_7 = arith.constant 0 : index
    %c0_8 = arith.constant 0 : index
    %11 = vector.load %arg4[%c0_7, %c0_8] : memref<128x128xf32, #tpu.memory_space<vmem>>, vector<128x128xf32>
    %cst_9 = arith.constant dense<0.000000e+00> : vector<8x128xf32>
    %12 = tpu.matmul %10, %11, %cst_9 {dimension_numbers = #tpu.dot_dimension_numbers<[1], [0], [0], [1], [0, 0, 1, 1], [], []>} : vector<8x128xf32>, vector<128x128xf32>, vector<8x128xf32> -> vector<8x128xf32>
    %c0_10 = arith.constant 0 : index
    %c0_11 = arith.constant 0 : index
    %13 = vector.load %arg5[%c0_10, %c0_11] : memref<1x128xf32, #tpu.memory_space<vmem>>, vector<1x128xf32>
    %14 = vector.broadcast %13 : vector<1x128xf32> to vector<8x128xf32>
    %15 = arith.addf %12, %14 : vector<8x128xf32>
    %cst_12 = arith.constant 0.000000e+00 : f32
    %16 = vector.broadcast %cst_12 : f32 to vector<8x128xf32>
    %17 = arith.cmpf ogt, %15, %16 : vector<8x128xf32>
    %cst_13 = arith.constant 0.00999999977 : f32
    %18 = vector.broadcast %cst_13 : f32 to vector<8x128xf32>
    %19 = arith.mulf %18, %15 : vector<8x128xf32>
    %20 = arith.select %17, %15, %19 : vector<8x128xi1>, vector<8x128xf32>
    %c0_14 = arith.constant 0 : index
    %c0_15 = arith.constant 0 : index
    %21 = vector.load %arg6[%c0_14, %c0_15] : memref<128x128xf32, #tpu.memory_space<vmem>>, vector<128x128xf32>
    %cst_16 = arith.constant dense<0.000000e+00> : vector<8x128xf32>
    %22 = tpu.matmul %20, %21, %cst_16 {dimension_numbers = #tpu.dot_dimension_numbers<[1], [0], [0], [1], [0, 0, 1, 1], [], []>} : vector<8x128xf32>, vector<128x128xf32>, vector<8x128xf32> -> vector<8x128xf32>
    %c0_17 = arith.constant 0 : index
    %c0_18 = arith.constant 0 : index
    %23 = vector.load %arg7[%c0_17, %c0_18] : memref<1x128xf32, #tpu.memory_space<vmem>>, vector<1x128xf32>
    %24 = vector.broadcast %23 : vector<1x128xf32> to vector<8x128xf32>
    %25 = arith.addf %22, %24 : vector<8x128xf32>
    %c0_19 = arith.constant 0 : index
    %c0_20 = arith.constant 0 : index
    %26 = vector.load %arg8[%c0_19, %c0_20] : memref<8x128xf32, #tpu.memory_space<vmem>>, vector<8x128xf32>
    tpu.vector_store %arg8[%c0_19, %c0_20], %25 {strides = array<i32>} : memref<8x128xf32, #tpu.memory_space<vmem>>, vector<8x128xf32>,
    return
  }
  func.func @transform_0(%arg0: i32) -> (i32, i32) {
    %c0_i32 = arith.constant 0 : i32
    %c0_i32_0 = arith.constant 0 : i32
    return %arg0, %c0_i32 : i32, i32
  }
  func.func @transform_1(%arg0: i32) -> (i32, i32) {
    %c0_i32 = arith.constant 0 : i32
    %c0_i32_0 = arith.constant 0 : i32
    %c0_i32_1 = arith.constant 0 : i32
    return %c0_i32, %c0_i32_0 : i32, i32
  }
  func.func @transform_2(%arg0: i32) -> (i32, i32) {
    %c0_i32 = arith.constant 0 : i32
    %c0_i32_0 = arith.constant 0 : i32
    %c0_i32_1 = arith.constant 0 : i32
    return %c0_i32, %c0_i32_0 : i32, i32
  }
  func.func @transform_3(%arg0: i32) -> (i32, i32) {
    %c0_i32 = arith.constant 0 : i32
    %c0_i32_0 = arith.constant 0 : i32
    %c0_i32_1 = arith.constant 0 : i32
    return %c0_i32, %c0_i32_0 : i32, i32
  }
  func.func @transform_4(%arg0: i32) -> (i32, i32) {
    %c0_i32 = arith.constant 0 : i32
    %c0_i32_0 = arith.constant 0 : i32
    %c0_i32_1 = arith.constant 0 : i32
    return %c0_i32, %c0_i32_0 : i32, i32
  }
  func.func @transform_5(%arg0: i32) -> (i32, i32) {
    %c0_i32 = arith.constant 0 : i32
    %c0_i32_0 = arith.constant 0 : i32
    %c0_i32_1 = arith.constant 0 : i32
    return %c0_i32, %c0_i32_0 : i32, i32
  }
  func.func @transform_6(%arg0: i32) -> (i32, i32) {
    %c0_i32 = arith.constant 0 : i32
    %c0_i32_0 = arith.constant 0 : i32
    %c0_i32_1 = arith.constant 0 : i32
    return %c0_i32, %c0_i32_0 : i32, i32
  }
  func.func @transform_7(%arg0: i32) -> (i32, i32) {
    %c0_i32 = arith.constant 0 : i32
    %c0_i32_0 = arith.constant 0 : i32
    return %arg0, %c0_i32 : i32, i32
  }
}

</mosaic_0001>

<bundles_post_ra>
// kernel: mlp_forward.1
= control target key start
LH: loop header
LB: loop body
LE: loop exit
PB: predicated region body
PF: predicated region fallthrough
CT: control target
= control target key end

     0   :  { %12 = vsyncpa [#allocation3], 0  ;;  %s394_s0 = inlined_call_operand.hbm [shape: f32[8,16], index: 0, kind: input, shape index: {}]   ;;  %s395_s1 = inlined_call_operand.hbm [shape: f32[16,128], index: 1, kind: input, shape index: {}]   ;;  %s396_s2 = inlined_call_operand.vmem [shape: f32[1,128], index: 2, kind: input, shape index: {}]   ;;  %s397_s3 = inlined_call_operand.hbm [shape: f32[128,128], index: 3, kind: input, shape index: {}]   ;;  %s398_s4 = inlined_call_operand.vmem [shape: f32[1,128], index: 4, kind: input, shape index: {}]   ;;  %s399_s5 = inlined_call_operand.hbm [shape: f32[128,128], index: 5, kind: input, shape index: {}]   ;;  %s400_s6 = inlined_call_operand.vmem [shape: f32[1,128], index: 6, kind: input, shape index: {}]   ;;  %s401_s7 = inlined_call_operand.vmem [shape: f32[8,128], index: 7, kind: output, shape index: {}]  }
   0x1   :  { %13 = vsyncpa [#allocation5], 0  ;;  %s30_s26 = sshll.u32 %s395_s1, 4  ;;  %s31_s26 = int_to_ptr.hbm [resolvable:$true] %s30_s26 }
   0x2   :  { %14 = vsyncpa [#allocation8], 0  ;;  %s324_s27 = smov [#allocation4]   ;;  %s20_s8 = sshll.u32 %s394_s0, 4  ;;  %s21_s8 = int_to_ptr.hbm [resolvable:$true] %s20_s8 }
   0x3   :  { %s32_s28 = sshll.u32 %s324_s27, 4  ;;  %s325_s9 = smov 128   ;;  %s33_s28 = int_to_ptr.vmem [resolvable:$true] %s32_s28 }
   0x4   :  { %s326_s10 = smov 8   ;;  %s327_s11 = smov [#allocation2]  }
   0x5   :  { %38 = dma.hbm_to_vmem [thread:$0]  %s31_s26, 256, %s33_s28, [#allocation5], %s325_s9, %s325_s9, %s326_s10  }
   0x6   :  { %s22_s12 = sshll.u32 %s327_s11, 4  ;;  %s45_s15 = sshll.u32 %s397_s3, 4  ;;  %s23_s12 = int_to_ptr.vmem [resolvable:$true] %s22_s12  ;;  %s46_s15 = int_to_ptr.hbm [resolvable:$true] %s45_s15 }
   0x7   :  { %25 = dma.hbm_to_vmem [thread:$0]  %s21_s8, 128, %s23_s12, [#allocation3]  }
   0x8   :  { %s60_s17 = sshll.u32 %s399_s5, 4  ;;  %s328_s18 = smov [#allocation6]   ;;  %s61_s17 = int_to_ptr.hbm [resolvable:$true] %s60_s17 }
   0x9   :  { %s47_s19 = sshll.u32 %s328_s18, 4  ;;  %s329_s0 = smov [#allocation7]   ;;  %s48_s19 = int_to_ptr.vmem [resolvable:$true] %s47_s19 }
   0xa   :  { %53 = dma.hbm_to_vmem [thread:$0]  %s46_s15, 2048, %s48_s19, [#allocation5], %s325_s9, %s325_s9, %s326_s10  }
   0xb   :  { %s62_s20 = sshll.u32 %s329_s0, 4  ;;  %s63_s20 = int_to_ptr.vmem [resolvable:$true] %s62_s20 }
   0xc   :  { %68 = dma.hbm_to_vmem [thread:$0]  %s61_s17, 2048, %s63_s20, [#allocation8], %s325_s9, %s325_s9, %s326_s10  }
   0xd   :  { %318 = dma.done.wait [#allocation3], 128  }
   0xe   :  { %319 = vsyncadd [#allocation3], 4294967168 }
   0xf   :  { %320 = dma.done.wait [#allocation5], 2304  }
  0x10   :  { %321 = vsyncadd [#allocation5], 4294964992 }
  0x11   :  { %322 = dma.done.wait [#allocation8], 2048  }
  0x12   :  { %323 = vsyncadd [#allocation8], 4294965248  ;;  %v89_v0 = vld [vmem:[#allocation4 + $0x8] sm:$0xff]  ;;  %v88_v1 = vld [vmem:[#allocation4] sm:$0xff]  ;;  %vm94_vm0 = vcmask 130048  }
  0x13   :  { %112 = vmatpush.msra.mxu0 %v89_v0  ;;  %v87_v2 = vld [vmem:[#allocation2] sm:$0xff]  ;;  %v136_v3 = vld [vmem:[#allocation6 + $0x78] sm:$0xff]  ;;  %v135_v4 = vld [vmem:[#allocation6 + $0x70] sm:$0xff] }
  0x14   :  { %141 = vmatpush.msra.mxu1 %v136_v3  ;;  %v134_v5 = vld [vmem:[#allocation6 + $0x68] sm:$0xff]  ;;  %v133_v6 = vld [vmem:[#allocation6 + $0x60] sm:$0xff]  ;;  %v132_v7 = vld [vmem:[#allocation6 + $0x58] sm:$0xff] }
  0x15   :  { %113 = vmatpush.msra.mxu0 %v88_v1  ;;  %v131_v8 = vld [vmem:[#allocation6 + $0x50] sm:$0xff]  ;;  %v130_v9 = vld [vmem:[#allocation6 + $0x48] sm:$0xff]  ;;  %v129_v10 = vld [vmem:[#allocation6 + $0x40] sm:$0xff] }
  0x16   :  { %212 = vmatmul.msk.f32.vlgmr.msra.gmra.mxu0 %vm94_vm0, %v87_v2  ;;  %142 = vmatpush.msra.mxu1 %v135_v4  ;;  %v128_v11 = vld [vmem:[#allocation6 + $0x38] sm:$0xff]  ;;  %v127_v12 = vld [vmem:[#allocation6 + $0x30] sm:$0xff]  ;;  %v126_v13 = vld [vmem:[#allocation6 + $0x28] sm:$0xff] }
  0x17   :  { %v125_v14 = vld [vmem:[#allocation6 + $0x20] sm:$0xff]  ;;  %v124_v15 = vld [vmem:[#allocation6 + $0x18] sm:$0xff]  ;;  %v123_v16 = vld [vmem:[#allocation6 + $0x10] sm:$0xff] }
  0x18   :  { %143 = vmatpush.msra.mxu1 %v134_v5  ;;  %v122_v17 = vld [vmem:[#allocation6 + $0x8] sm:$0xff]  ;;  %v121_v18 = vld [vmem:[#allocation6] sm:$0xff]  ;;  %v179_v19 = vld [vmem:[#allocation7 + $0x78] sm:$0xff] }
  0x19   :  { %v178_v20 = vld [vmem:[#allocation7 + $0x70] sm:$0xff]  ;;  %184 = vmatpush.msra.mxu2 %v179_v19  ;;  %v177_v21 = vld [vmem:[#allocation7 + $0x68] sm:$0xff]  ;;  %v176_v22 = vld [vmem:[#allocation7 + $0x60] sm:$0xff] }
  0x1a   :  { %144 = vmatpush.msra.mxu1 %v133_v6  ;;  %v175_v23 = vld [vmem:[#allocation7 + $0x58] sm:$0xff]  ;;  %v174_v24 = vld [vmem:[#allocation7 + $0x50] sm:$0xff]  ;;  %v173_v25 = vld [vmem:[#allocation7 + $0x48] sm:$0xff] }
  0x1b   :  { %185 = vmatpush.msra.mxu2 %v178_v20  ;;  %v172_v26 = vld [vmem:[#allocation7 + $0x40] sm:$0xff]  ;;  %v171_v27 = vld [vmem:[#allocation7 + $0x38] sm:$0xff]  ;;  %v170_v28 = vld [vmem:[#allocation7 + $0x30] sm:$0xff] }
  0x1c   :  { %145 = vmatpush.msra.mxu1 %v132_v7  ;;  %v169_v29 = vld [vmem:[#allocation7 + $0x28] sm:$0xff]  ;;  %v168_v30 = vld [vmem:[#allocation7 + $0x20] sm:$0xff]  ;;  %v167_v31 = vld [vmem:[#allocation7 + $0x18] sm:$0xff] }
  0x1d   :  { %186 = vmatpush.msra.mxu2 %v177_v21  ;;  %v219_v32 = vld [vmem:[%s396_s2] ss:$0 sm:$0xff]  ;;  %v166_v37 = vld [vmem:[#allocation7 + $0x10] sm:$0xff]  ;;  %v164_v39 = vld [vmem:[#allocation7] sm:$0xff] }
  0x1e   :  { %146 = vmatpush.msra.mxu1 %v131_v8  ;;  %v165_v38 = vld [vmem:[#allocation7 + $0x8] sm:$0xff] }
  0x1f   :  { %187 = vmatpush.msra.mxu2 %v176_v22  ;;  %v220_v40 = vld [vmem:[%s398_s4] ss:$0 sm:$0xff] }
  0x20   :  { %147 = vmatpush.msra.mxu1 %v130_v9  ;;  %v221_v45 = vld [vmem:[%s400_s6] ss:$0 sm:$0xff] }
  0x21   :  { %188 = vmatpush.msra.mxu2 %v175_v23 }
  0x22   :  { %148 = vmatpush.msra.mxu1 %v129_v10 }
  0x23   :  { %189 = vmatpush.msra.mxu2 %v174_v24 }
  0x24   :  { %149 = vmatpush.msra.mxu1 %v128_v11 }
  0x25   :  { %190 = vmatpush.msra.mxu2 %v173_v25 }
  0x26   :  { %150 = vmatpush.msra.mxu1 %v127_v12 }
  0x27   :  { %191 = vmatpush.msra.mxu2 %v172_v26 }
  0x28   :  { %151 = vmatpush.msra.mxu1 %v126_v13 }
  0x29   :  { %192 = vmatpush.msra.mxu2 %v171_v27 }
  0x2a   :  { %152 = vmatpush.msra.mxu1 %v125_v14 }
  0x2b   :  { %193 = vmatpush.msra.mxu2 %v170_v28 }
  0x2c   :  { %153 = vmatpush.msra.mxu1 %v124_v15 }
  0x2d   :  { %194 = vmatpush.msra.mxu2 %v169_v29 }
  0x2e   :  { %154 = vmatpush.msra.mxu1 %v123_v16 }
  0x2f   :  { %195 = vmatpush.msra.mxu2 %v168_v30 }
  0x30   :  { %155 = vmatpush.msra.mxu1 %v122_v17 }
  0x31   :  { %196 = vmatpush.msra.mxu2 %v167_v31 }
  0x32   :  { %156 = vmatpush.msra.mxu1 %v121_v18 }
  0x33   :  { %197 = vmatpush.msra.mxu2 %v166_v37 }
  0x35   :  { %198 = vmatpush.msra.mxu2 %v165_v38 }
  0x37   :  { %199 = vmatpush.msra.mxu2 %v164_v39 }
  0x93   :  { %v115_v33 = vpop.f32.mrf.mxu0 }
  0x94   :  { %v116_v34 = vadd.f32 %v219_v32, %v115_v33 }
  0x96   :  { %vm118_vm1 = vcmp.gt.f32.partialorder %v116_v34, 0.0  ;;  %v119_v35 = vmul.f32 0.01, %v116_v34 }
  0x98   :  { %v120_v36 = vsel %vm118_vm1, %v116_v34, %v119_v35 }
  0x99   :  { %157 = vmatmul.f32.vlgmr.msra.gmra.mxu1 %v120_v36 }
 0x116   :  { %v158_v41 = vpop.f32.mrf.mxu1 }
 0x117   :  { %v159_v42 = vadd.f32 %v220_v40, %v158_v41 }
 0x119   :  { %vm161_vm2 = vcmp.gt.f32.partialorder %v159_v42, 0.0  ;;  %v162_v43 = vmul.f32 0.01, %v159_v42 }
 0x11b   :  { %v163_v44 = vsel %vm161_vm2, %v159_v42, %v162_v43 }
 0x11c   :  { %200 = vmatmul.f32.vlgmr.msra.gmra.mxu2 %v163_v44 }
 0x19f   :  { %v201_v46 = vpop.f32.mrf.mxu2 }
 0x1a0   :  { %v202_v47 = vadd.f32 %v221_v45, %v201_v46 }
 0x1a2   :  { %204 = vst [vmem:[%s401_s7] sm:$0xff] %v202_v47 }
 0x1a3   :  { %209 = vsyncpa [#allocation3], 1 }
 0x1a4   :  { %210 = vsyncpa [#allocation5], 1 }
 0x1a5   :  { %211 = vsyncpa [#allocation8], 1 }

</bundles_post_ra>
